<compile_context>
chip_gen: v5e
topology: v5e:2x2
jax: 0.10.0
libtpu: 0.0.40
codegen_flags: <defaults>
</compile_context>

<pallas_src>
import functools

import jax
import jax.numpy as jnp
from jax.experimental import pallas as pl
from jax.experimental.pallas import tpu as pltpu


def _round_up(a: int, b: int) -> int:
    return ((a + b - 1) // b) * b


def _tpu_vmem_capacity_bytes() -> int:
    """Per-TensorCore VMEM capacity; conservative fallback if query unavailable."""
    try:
        return int(pltpu.get_tpu_info().vmem_capacity_bytes)
    except Exception:
        return 64 << 20  # v7x per-TC VMEM -- the smallest across v5e/v6e/v7x.


def _linear_kernel(x_ref, w_ref, b_ref, o_ref):
    # x_ref: (TM, D_in) native dtype   w_ref: (D_in, N) bf16 (resident)
    # b_ref: (1, N) f32 (resident)     o_ref: (TM, N) out dtype
    x = x_ref[...].astype(w_ref.dtype)  # VPU cast, hidden under DMA/MXU.
    acc = jnp.dot(x, w_ref[...], preferred_element_type=jnp.float32)
    o_ref[...] = (acc + b_ref[...]).astype(o_ref.dtype)


@functools.partial(
    jax.jit, static_argnames=("d_out", "tile_m", "out_dtype", "compute_dtype")
)
def linear_projection(x, weight_t, bias, *, d_out=None, tile_m=1024,
                      out_dtype=None, compute_dtype=jnp.bfloat16):
    """x: (B, T, D_in); weight_t: (D_in, N) with N padded to 128; bias: (N,).

    Returns (B, T, d_out).  `tile_m` is the requested rows-per-grid-step; it is
    clamped so that 2x double-buffered x/out tiles + the single-buffered weight fit
    the chip's VMEM (limit set explicitly via vmem_limit_bytes -- do NOT rely on the
    scoped defaults: 16 MiB on v5e, 32 MiB on v6e/v7x).
    """
    B, T, D_in = x.shape
    N = weight_t.shape[1]                      # padded output width
    d_out = N if d_out is None else d_out
    out_dtype = x.dtype if out_dtype is None else jnp.dtype(out_dtype)
    M = B * T

    x_bytes = jnp.dtype(x.dtype).itemsize
    w_bytes = jnp.dtype(compute_dtype).itemsize
    o_bytes = jnp.dtype(out_dtype).itemsize

    # --- chip-aware VMEM budget ---------------------------------------------
    vmem_cap = _tpu_vmem_capacity_bytes()
    vmem_limit = min((vmem_cap * 3) // 4, 64 << 20)   # <= physical on all gens
    resident = D_in * N * w_bytes + N * 4             # Buffered(1) weight + bias
    tile_budget = max(vmem_limit - resident - (4 << 20), 1 << 20)

    # --- row-tile selection ----------------------------------------------------
    TM = max(16, min(tile_m, _round_up(M, 16)))
    # v7x megacore: prefer >= 2 grid steps so both TensorCores get work.
    if pl.cdiv(M, TM) < 2:
        tm_half = _round_up(pl.cdiv(M, 2), 16)
        if tm_half < M:
            TM = tm_half
    # Shrink TM until the streamed (double-buffered) tiles fit the budget.
    while TM > 16 and 2 * TM * (D_in * x_bytes + N * o_bytes) > tile_budget:
        TM = max(16, _round_up(TM // 2, 16))

    grid_m = pl.cdiv(M, TM)   # ragged last block handled by Pallas masking.

    b2d = bias.reshape(1, N).astype(jnp.float32)

    cost = pl.CostEstimate(
        flops=2 * M * D_in * N,
        bytes_accessed=M * D_in * x_bytes + D_in * N * w_bytes
        + N * 4 + M * N * o_bytes,
        transcendentals=0,
    )

    out2d = pl.pallas_call(
        _linear_kernel,
        out_shape=jax.ShapeDtypeStruct((M, N), out_dtype),
        grid_spec=pltpu.PrefetchScalarGridSpec(
            num_scalar_prefetch=0,
            grid=(grid_m,),
            in_specs=[
                # Streamed activation rows, native dtype (cast happens in-kernel).
                pl.BlockSpec((TM, D_in), lambda i: (i, 0)),
                # Resident weight / bias: constant index_map -> single buffer.
                pl.BlockSpec((D_in, N), lambda i: (0, 0),
                             pipeline_mode=pl.Buffered(1)),
                pl.BlockSpec((1, N), lambda i: (0, 0),
                             pipeline_mode=pl.Buffered(1)),
            ],
            out_specs=pl.BlockSpec((TM, N), lambda i: (i, 0)),
        ),
        compiler_params=pltpu.CompilerParams(
            dimension_semantics=("parallel",),
            vmem_limit_bytes=int(vmem_limit),
        ),
        cost_estimate=cost,
    )(x.reshape(M, D_in), weight_t.astype(compute_dtype), b2d)

    out = out2d.reshape(B, T, N)
    if d_out != N:
        # Only hit when D_out % 128 != 0; keep D_out a multiple of 128 to make
        # this a no-op (the slice is an extra HBM pass over the output).
        out = out[..., :d_out]
    return out


def init_params(key, input_size, output_size, dtype=jnp.float32):
    """Xavier-uniform weight (gain('linear') = 1.0), PyTorch-default bias init.

    The weight is returned pre-transposed to (D_in, N) and the output axis of
    weight/bias is zero-padded ONCE here to a multiple of 128, so the kernel's
    output stores are lane-dense and no per-call padding of params happens on the
    hot path.  Padded columns are exact zeros and never change the valid outputs.
    """
    kw, kb = jax.random.split(key)
    # torch.nn.init.xavier_uniform_ on weight of shape (out, in):
    bound_w = (6.0 / (input_size + output_size)) ** 0.5
    weight = jax.random.uniform(
        kw, (output_size, input_size), dtype, -bound_w, bound_w
    )
    # torch.nn.Linear default bias init: U(-1/sqrt(fan_in), 1/sqrt(fan_in))
    bound_b = 1.0 / (input_size ** 0.5)
    bias = jax.random.uniform(kb, (output_size,), dtype, -bound_b, bound_b)

    n_pad = _round_up(output_size, 128)
    weight_t = weight.T                                   # (D_in, D_out)
    if n_pad != output_size:
        weight_t = jnp.pad(weight_t, ((0, 0), (0, n_pad - output_size)))
        bias = jnp.pad(bias, (0, n_pad - output_size))
    return weight_t, bias                                 # (D_in, N), (N,)


def linear_projection_forward(x, input_lengths, weight_t, bias, *, output_size,
                              dropout_rate=0.0, training=False):
    """Mirrors LinearProjection.forward: returns (output, input_lengths)."""
    if training and dropout_rate > 0.0:
        # TODO(synk): in-kernel training-mode dropout (pltpu.prng_seed /
        # stateful_bernoulli) not implemented; module default p=0.0 / eval is identity.
        raise NotImplementedError("training-mode dropout (p > 0) is not implemented")
    out = linear_projection(x, weight_t, bias, d_out=output_size)
    return out, input_lengths


if __name__ == "__main__":
    key = jax.random.PRNGKey(0)
    k_x, k_p = jax.random.split(key)

    B, T, D_IN, D_OUT = 2, 8, 32, 64
    x = jax.random.normal(k_x, (B, T, D_IN), dtype=jnp.float32)
    input_lengths = jnp.array([T, T - 2], dtype=jnp.int32)

    weight_t, bias = init_params(k_p, D_IN, D_OUT)   # padded to (32, 128) / (128,)

    out, out_lengths = linear_projection_forward(
        x, input_lengths, weight_t, bias, output_size=D_OUT
    )
    out = jax.block_until_ready(out)

    # Valid (unpadded) parameter views for the references.
    w_valid = weight_t[:, :D_OUT]
    b_valid = bias[:D_OUT]

    # Reference 1: same bf16-operand cast + fp32 accumulation as the kernel.
    xb = x.reshape(-1, D_IN).astype(jnp.bfloat16)
    ref_bf16 = (
        jnp.dot(xb, w_valid.astype(jnp.bfloat16), preferred_element_type=jnp.float32)
        + b_valid
    ).reshape(B, T, D_OUT)
    # Reference 2: full fp32 math (loose tolerance covers the bf16 operand cast).
    ref_fp32 = x @ w_valid + b_valid

    assert out.shape == (B, T, D_OUT)
    assert out.dtype == x.dtype
    assert jnp.allclose(out, ref_bf16, atol=1e-4, rtol=1e-4)
    assert jnp.allclose(out, ref_fp32, atol=5e-2, rtol=5e-2)
    assert jnp.array_equal(out_lengths, input_lengths)

    print("KERNEL_OK")
</pallas_src>

<mosaic_0001>
module attributes {stable_mosaic.version = 11 : i64} {
  func.func @_linear_kernel(%arg0: i32, %arg1: memref<16x32xf32, #tpu.memory_space<vmem>>, %arg2: memref<32x128xbf16, #tpu.memory_space<vmem>>, %arg3: memref<1x128xf32, #tpu.memory_space<vmem>>, %arg4: memref<16x128xf32, #tpu.memory_space<vmem>>) attributes {dimension_semantics = [#tpu.dimension_semantics<parallel>], iteration_bounds = array<i64: 1>, scalar_prefetch = 0 : i64, scratch_operands = 0 : i64, tpu.core_type = #tpu.core_type<tc>, window_params = [{transform_indices = @transform_0, window_bounds = array<i64: 16, 32>}, {pipeline_mode = #tpu.pipeline_mode<synchronous>, transform_indices = @transform_1, window_bounds = array<i64: 32, 128>}, {pipeline_mode = #tpu.pipeline_mode<synchronous>, transform_indices = @transform_2, window_bounds = array<i64: 1, 128>}, {transform_indices = @transform_3, window_bounds = array<i64: 16, 128>}]} {
    %c0 = arith.constant 0 : index
    %c0_0 = arith.constant 0 : index
    %0 = vector.load %arg1[%c0, %c0_0] : memref<16x32xf32, #tpu.memory_space<vmem>>, vector<16x32xf32>
    %1 = arith.truncf %0 : vector<16x32xf32> to vector<16x32xbf16>
    %c0_1 = arith.constant 0 : index
    %c0_2 = arith.constant 0 : index
    %2 = vector.load %arg2[%c0_1, %c0_2] : memref<32x128xbf16, #tpu.memory_space<vmem>>, vector<32x128xbf16>
    %cst = arith.constant dense<0.000000e+00> : vector<16x128xf32>
    %3 = tpu.matmul %1, %2, %cst {dimension_numbers = #tpu.dot_dimension_numbers<[1], [0], [0], [1], [0, 0, 1, 1], [], []>} : vector<16x32xbf16>, vector<32x128xbf16>, vector<16x128xf32> -> vector<16x128xf32>
    %c0_3 = arith.constant 0 : index
    %c0_4 = arith.constant 0 : index
    %4 = vector.load %arg3[%c0_3, %c0_4] : memref<1x128xf32, #tpu.memory_space<vmem>>, vector<1x128xf32>
    %5 = vector.broadcast %4 : vector<1x128xf32> to vector<16x128xf32>
    %6 = arith.addf %3, %5 : vector<16x128xf32>
    %c0_5 = arith.constant 0 : index
    %c0_6 = arith.constant 0 : index
    %7 = vector.load %arg4[%c0_5, %c0_6] : memref<16x128xf32, #tpu.memory_space<vmem>>, vector<16x128xf32>
    tpu.vector_store %arg4[%c0_5, %c0_6], %6 {strides = array<i32>} : memref<16x128xf32, #tpu.memory_space<vmem>>, vector<16x128xf32>,
    return
  }
  func.func @transform_0(%arg0: i32) -> (i32, i32) {
    %c0_i32 = arith.constant 0 : i32
    %c0_i32_0 = arith.constant 0 : i32
    return %arg0, %c0_i32 : i32, i32
  }
  func.func @transform_1(%arg0: i32) -> (i32, i32) {
    %c0_i32 = arith.constant 0 : i32
    %c0_i32_0 = arith.constant 0 : i32
    %c0_i32_1 = arith.constant 0 : i32
    return %c0_i32, %c0_i32_0 : i32, i32
  }
  func.func @transform_2(%arg0: i32) -> (i32, i32) {
    %c0_i32 = arith.constant 0 : i32
    %c0_i32_0 = arith.constant 0 : i32
    %c0_i32_1 = arith.constant 0 : i32
    return %c0_i32, %c0_i32_0 : i32, i32
  }
  func.func @transform_3(%arg0: i32) -> (i32, i32) {
    %c0_i32 = arith.constant 0 : i32
    %c0_i32_0 = arith.constant 0 : i32
    return %arg0, %c0_i32 : i32, i32
  }
}

</mosaic_0001>

<bundles_post_ra>
// kernel: linear_projection.1
= control target key start
LH: loop header
LB: loop body
LE: loop exit
PB: predicated region body
PF: predicated region fallthrough
CT: control target
= control target key end

     0   :  { %s159_s0 = inlined_call_operand.vmem [shape: f32[16,32], index: 0, kind: input, shape index: {}]   ;;  %s160_s1 = inlined_call_operand.vmem [shape: bf16[32,128], index: 1, kind: input, shape index: {}]   ;;  %s161_s2 = inlined_call_operand.vmem [shape: f32[1,128], index: 2, kind: input, shape index: {}]   ;;  %s162_s3 = inlined_call_operand.hbm [shape: f32[16,128], index: 3, kind: output, shape index: {}]  }
   0x1   :  { %v87_v0 = vld [vmem:[%s160_s1 + $0x8] sm:$0xff]  ;;  %v86_v1 = vld [vmem:[%s160_s1] sm:$0xff] }
   0x2   :  { %49 = vmatpush.bf16.msra.mxu0 %v87_v0  ;;  %v16_v2 = vld [vmem:[%s159_s0] sm:$0xff]  ;;  %v17_v3 = vld [vmem:[%s159_s0 + $0x8] sm:$0xff] }
   0x3   :  { %8 = vsyncpa [#allocation3], 0  ;;  %v18_v4 = vpack.c.bf16 %v17_v3, %v16_v2  ;;  %vm39_vm0 = vcmask 261120   ;;  %v91_v5 = vld [vmem:[%s161_s2] ss:$0 sm:$0xff]  ;;  %s118_s1 = smov [#allocation2]  }
   0x4   :  { %s63_s22 = sshll.u32 %s118_s1, 4  ;;  %s65_s25 = sshll.u32 %s162_s3, 4  ;;  %s64_s22 = int_to_ptr.vmem [resolvable:$true] %s63_s22  ;;  %s66_s25 = int_to_ptr.hbm [resolvable:$true] %s65_s25 }
   0x5   :  { %s119_s0 = smov 128   ;;  %s120_s26 = smov 8  }
   0x6   :  { %50 = vmatpush.bf16.msra.mxu0 %v86_v1 }
   0x9   :  { %85 = vmatmul.msk.bf16.vlgmr.msra.gmra.mxu0 %vm39_vm0, %v18_v4 }
  0x86   :  { %v52_v6 = vpop.f32.mrf.mxu0 }
  0x87   :  { %v53_v7 = vadd.f32 %v91_v5, %v52_v6 }
  0x89   :  { %57 = vst [vmem:[#allocation2] sm:$0xff] %v53_v7 }
  0x8e   :  { %v54_v8 = vpop.f32.mrf.mxu0 }
  0x8f   :  { %v55_v9 = vadd.f32 %v91_v5, %v54_v8 }
  0x91   :  { %58 = vst [vmem:[#allocation2 + $0x8] sm:$0xff] %v55_v9 }
  0x92   :  { %71 = dma.vmem_to_hbm [thread:$0]  %s64_s22, 256, %s66_s25, [#allocation3], %s119_s0, %s119_s0, %s120_s26  }
  0x93   :  { %116 = dma.done.wait [#allocation3], 256  }
  0x94   :  { %117 = vsyncadd [#allocation3], 4294967040 }
  0x95   :  { %76 = vsyncpa [#allocation3], 1 }

</bundles_post_ra>
